<compile_context>
chip_gen: v7x
topology: tpu7x:2x2x1
jax: 0.10.0
libtpu: 0.0.40
codegen_flags: <defaults>
</compile_context>

<pallas_src>
import jax
import jax.numpy as jnp
from jax.experimental import pallas as pl
from jax.experimental.pallas import tpu as pltpu


def _charcnn_kernel(x_ref, m_ref, b_ref, out_ref):
    # x_ref:   (Bt, L)     int32 char ids for this batch tile
    # m_ref:   (3V, H)     fused (embedding @ conv-tap) weights, tap-major
    # b_ref:   (1, H)      conv bias (f32)
    # out_ref: (Bt, L*H)   lane-dense output block
    bt, L = x_ref.shape
    V3, H = m_ref.shape
    V = V3 // 3

    xv = x_ref[...]                                           # (Bt, L) int32
    m = m_ref[...]                                            # (3V, H)
    bias = b_ref[...]                                         # (1, H) f32

    # Hoisted once: lane index 0..3V-1 (used to build one-hots by comparison).
    j_iota = jax.lax.broadcasted_iota(jnp.int32, (bt, V3), 1)

    # Static unroll over word positions (L is small).
    for l in range(L):
        # Build the fused 3-tap one-hot LHS: block k holds onehot(x[:, l+k-1]).
        # Out-of-range taps (the Conv1d zero padding) are simply skipped,
        # which leaves that V-block all-zero.
        lhs = jnp.zeros((bt, V3), jnp.float32)
        for k, j in enumerate((l - 1, l, l + 1)):
            if 0 <= j < L:
                idx = xv[:, j:j + 1]                          # (Bt, 1)
                lhs = lhs + (j_iota == idx + k * V).astype(jnp.float32)

        # One MXU contraction per position: (Bt, 3V) x (3V, H) -> (Bt, H),
        # f32 accumulation; bias add in f32 (v5e-safe epilogue).
        piece = jnp.dot(lhs.astype(m.dtype), m,
                        preferred_element_type=jnp.float32) + bias

        # Static lane-offset store into the lane-dense (Bt, L*H) block.
        out_ref[:, l * H:(l + 1) * H] = piece


def charcnn_forward(x, char_emb_table, conv_w, conv_b,
                    *, block_b=128, param_dtype=jnp.float32):
    """
    x:              (B, L) int char indices
    char_emb_table: (V, E) float32
    conv_w:         (H, E, 3) float32   (PyTorch Conv1d weight layout)
    conv_b:         (H,) float32
    returns:        (B, L*H) float32    == CharCNN.get_all_hiddens(x)
    """
    B, L = x.shape
    V, E = char_emb_table.shape
    H = conv_w.shape[0]

    # One-time weight prep (independent of batch):
    # m_all[k*V + v, h] = sum_e table[v, e] * W[h, e, k]
    m_all = jnp.einsum('ve,hek->kvh', char_emb_table.astype(jnp.float32),
                       conv_w.astype(jnp.float32)).reshape(3 * V, H)
    m_all = m_all.astype(param_dtype)          # bf16 on v6e/v7x if desired
    b_row = conv_b.reshape(1, H).astype(jnp.float32)

    # Batch tiling: Bt rows per grid step (single step at toy sizes).
    bt = min(block_b, B)
    b_pad = -(-B // bt) * bt
    x = x.astype(jnp.int32)
    if b_pad != B:
        x = jnp.pad(x, ((0, b_pad - B), (0, 0)))   # padded rows use id 0, dropped below

    out = pl.pallas_call(
        _charcnn_kernel,
        out_shape=jax.ShapeDtypeStruct((b_pad, L * H), jnp.float32),
        grid_spec=pltpu.PrefetchScalarGridSpec(
            num_scalar_prefetch=0,
            grid=(b_pad // bt,),
            in_specs=[
                pl.BlockSpec((bt, L), lambda i: (i, 0)),        # char ids tile
                pl.BlockSpec((3 * V, H), lambda i: (0, 0)),     # fused weights (resident)
                pl.BlockSpec((1, H), lambda i: (0, 0)),         # bias (resident)
            ],
            out_specs=pl.BlockSpec((bt, L * H), lambda i: (i, 0)),
        ),
        compiler_params=pltpu.CompilerParams(
            dimension_semantics=("parallel",)),
    )(x, m_all, b_row)

    return out[:B]


def init_params(key, alphabet_size, embedding_dim, hidden_dim):
    k_emb, k_conv = jax.random.split(key)
    # random_embedding: uniform in [-sqrt(3/E), sqrt(3/E)]
    scale = jnp.sqrt(3.0 / embedding_dim)
    emb_table = jax.random.uniform(
        k_emb, (alphabet_size, embedding_dim),
        minval=-scale, maxval=scale, dtype=jnp.float32)
    # xavier_normal_ on Conv1d weight (H, E, 3)
    fan_in = embedding_dim * 3
    fan_out = hidden_dim * 3
    std = jnp.sqrt(2.0 / (fan_in + fan_out))
    conv_w = std * jax.random.normal(
        k_conv, (hidden_dim, embedding_dim, 3), dtype=jnp.float32)
    conv_b = jnp.full((hidden_dim,), 0.3, dtype=jnp.float32)
    return emb_table, conv_w, conv_b


if __name__ == "__main__":
    ALPHABET = 20
    EMB_DIM = 32
    HIDDEN = 32
    BATCH = 2
    WORD_LEN = 8

    key = jax.random.PRNGKey(0)
    k_params, k_x = jax.random.split(key)
    emb_table, conv_w, conv_b = init_params(k_params, ALPHABET, EMB_DIM, HIDDEN)

    x = jax.random.randint(k_x, (BATCH, WORD_LEN), 0, ALPHABET, dtype=jnp.int32)

    out = charcnn_forward(x, emb_table, conv_w, conv_b)
    jax.block_until_ready(out)

    # Reference: plain-JAX embedding + Conv1d(padding=1) path.
    emb = jnp.take(emb_table, x, axis=0)                      # (B, L, E)
    emb_ncl = jnp.transpose(emb, (0, 2, 1))                   # (B, E, L)
    ref = jax.lax.conv_general_dilated(
        emb_ncl, conv_w, window_strides=(1,), padding=((1, 1),),
        dimension_numbers=("NCH", "OIH", "NCH"))
    ref = ref + conv_b[None, :, None]
    ref = jnp.transpose(ref, (0, 2, 1)).reshape(BATCH, -1)    # (B, L*H)

    assert out.shape == (BATCH, WORD_LEN * HIDDEN)
    assert jnp.allclose(out, ref, atol=1e-4, rtol=1e-4)

    print("KERNEL_OK")
</pallas_src>

<mosaic_0001>
module attributes {stable_mosaic.version = 11 : i64} {
  func.func @_charcnn_kernel(%arg0: i32, %arg1: memref<2x8xi32, #tpu.memory_space<vmem>>, %arg2: memref<60x32xf32, #tpu.memory_space<vmem>>, %arg3: memref<1x32xf32, #tpu.memory_space<vmem>>, %arg4: memref<2x256xf32, #tpu.memory_space<vmem>>) attributes {dimension_semantics = [#tpu.dimension_semantics<parallel>], iteration_bounds = array<i64: 1>, scalar_prefetch = 0 : i64, scratch_operands = 0 : i64, tpu.core_type = #tpu.core_type<tc>, window_params = [{transform_indices = @transform_0, window_bounds = array<i64: 2, 8>}, {pipeline_mode = #tpu.pipeline_mode<synchronous>, transform_indices = @transform_1, window_bounds = array<i64: 60, 32>}, {pipeline_mode = #tpu.pipeline_mode<synchronous>, transform_indices = @transform_2, window_bounds = array<i64: 1, 32>}, {transform_indices = @transform_3, window_bounds = array<i64: 2, 256>}]} {
    %c0 = arith.constant 0 : index
    %c0_0 = arith.constant 0 : index
    %0 = vector.load %arg1[%c0, %c0_0] : memref<2x8xi32, #tpu.memory_space<vmem>>, vector<2x8xi32>
    %c0_1 = arith.constant 0 : index
    %c0_2 = arith.constant 0 : index
    %1 = vector.load %arg2[%c0_1, %c0_2] : memref<60x32xf32, #tpu.memory_space<vmem>>, vector<60x32xf32>
    %c0_3 = arith.constant 0 : index
    %c0_4 = arith.constant 0 : index
    %2 = vector.load %arg3[%c0_3, %c0_4] : memref<1x32xf32, #tpu.memory_space<vmem>>, vector<1x32xf32>
    %3 = tpu.iota {dimensions = array<i32: 1>} : vector<2x60xi32>
    %cst = arith.constant 0.000000e+00 : f32
    %4 = vector.broadcast %cst : f32 to vector<2x60xf32>
    %5 = vector.extract_strided_slice %0 {offsets = [0, 0], sizes = [2, 1], strides = [1, 1]} : vector<2x8xi32> to vector<2x1xi32>
    %c20_i32 = arith.constant 20 : i32
    %6 = vector.broadcast %c20_i32 : i32 to vector<2x1xi32>
    %7 = arith.addi %5, %6 : vector<2x1xi32>
    %8 = vector.broadcast %7 : vector<2x1xi32> to vector<2x60xi32>
    %9 = arith.cmpi eq, %3, %8 : vector<2x60xi32>
    %10 = arith.extui %9 : vector<2x60xi1> to vector<2x60xi32>
    %11 = arith.sitofp %10 : vector<2x60xi32> to vector<2x60xf32>
    %12 = arith.addf %4, %11 : vector<2x60xf32>
    %13 = vector.extract_strided_slice %0 {offsets = [0, 1], sizes = [2, 1], strides = [1, 1]} : vector<2x8xi32> to vector<2x1xi32>
    %c40_i32 = arith.constant 40 : i32
    %14 = vector.broadcast %c40_i32 : i32 to vector<2x1xi32>
    %15 = arith.addi %13, %14 : vector<2x1xi32>
    %16 = vector.broadcast %15 : vector<2x1xi32> to vector<2x60xi32>
    %17 = arith.cmpi eq, %3, %16 : vector<2x60xi32>
    %18 = arith.extui %17 : vector<2x60xi1> to vector<2x60xi32>
    %19 = arith.sitofp %18 : vector<2x60xi32> to vector<2x60xf32>
    %20 = arith.addf %12, %19 : vector<2x60xf32>
    %cst_5 = arith.constant dense<0.000000e+00> : vector<2x32xf32>
    %21 = tpu.matmul %20, %1, %cst_5 {dimension_numbers = #tpu.dot_dimension_numbers<[1], [0], [0], [1], [0, 0, 1, 1], [], []>} : vector<2x60xf32>, vector<60x32xf32>, vector<2x32xf32> -> vector<2x32xf32>
    %22 = vector.broadcast %2 : vector<1x32xf32> to vector<2x32xf32>
    %23 = arith.addf %21, %22 : vector<2x32xf32>
    %c0_6 = arith.constant 0 : index
    %c0_7 = arith.constant 0 : index
    %24 = vector.load %arg4[%c0_6, %c0_7] : memref<2x256xf32, #tpu.memory_space<vmem>>, vector<2x32xf32>
    tpu.vector_store %arg4[%c0_6, %c0_7], %23 {strides = array<i32>} : memref<2x256xf32, #tpu.memory_space<vmem>>, vector<2x32xf32>,
    %cst_8 = arith.constant 0.000000e+00 : f32
    %25 = vector.broadcast %cst_8 : f32 to vector<2x60xf32>
    %26 = vector.extract_strided_slice %0 {offsets = [0, 0], sizes = [2, 1], strides = [1, 1]} : vector<2x8xi32> to vector<2x1xi32>
    %c0_i32 = arith.constant 0 : i32
    %27 = vector.broadcast %c0_i32 : i32 to vector<2x1xi32>
    %28 = arith.addi %26, %27 : vector<2x1xi32>
    %29 = vector.broadcast %28 : vector<2x1xi32> to vector<2x60xi32>
    %30 = arith.cmpi eq, %3, %29 : vector<2x60xi32>
    %31 = arith.extui %30 : vector<2x60xi1> to vector<2x60xi32>
    %32 = arith.sitofp %31 : vector<2x60xi32> to vector<2x60xf32>
    %33 = arith.addf %25, %32 : vector<2x60xf32>
    %34 = vector.extract_strided_slice %0 {offsets = [0, 1], sizes = [2, 1], strides = [1, 1]} : vector<2x8xi32> to vector<2x1xi32>
    %c20_i32_9 = arith.constant 20 : i32
    %35 = vector.broadcast %c20_i32_9 : i32 to vector<2x1xi32>
    %36 = arith.addi %34, %35 : vector<2x1xi32>
    %37 = vector.broadcast %36 : vector<2x1xi32> to vector<2x60xi32>
    %38 = arith.cmpi eq, %3, %37 : vector<2x60xi32>
    %39 = arith.extui %38 : vector<2x60xi1> to vector<2x60xi32>
    %40 = arith.sitofp %39 : vector<2x60xi32> to vector<2x60xf32>
    %41 = arith.addf %33, %40 : vector<2x60xf32>
    %42 = vector.extract_strided_slice %0 {offsets = [0, 2], sizes = [2, 1], strides = [1, 1]} : vector<2x8xi32> to vector<2x1xi32>
    %c40_i32_10 = arith.constant 40 : i32
    %43 = vector.broadcast %c40_i32_10 : i32 to vector<2x1xi32>
    %44 = arith.addi %42, %43 : vector<2x1xi32>
    %45 = vector.broadcast %44 : vector<2x1xi32> to vector<2x60xi32>
    %46 = arith.cmpi eq, %3, %45 : vector<2x60xi32>
    %47 = arith.extui %46 : vector<2x60xi1> to vector<2x60xi32>
    %48 = arith.sitofp %47 : vector<2x60xi32> to vector<2x60xf32>
    %49 = arith.addf %41, %48 : vector<2x60xf32>
    %cst_11 = arith.constant dense<0.000000e+00> : vector<2x32xf32>
    %50 = tpu.matmul %49, %1, %cst_11 {dimension_numbers = #tpu.dot_dimension_numbers<[1], [0], [0], [1], [0, 0, 1, 1], [], []>} : vector<2x60xf32>, vector<60x32xf32>, vector<2x32xf32> -> vector<2x32xf32>
    %51 = vector.broadcast %2 : vector<1x32xf32> to vector<2x32xf32>
    %52 = arith.addf %50, %51 : vector<2x32xf32>
    %c0_12 = arith.constant 0 : index
    %c32 = arith.constant 32 : index
    %53 = vector.load %arg4[%c0_12, %c32] : memref<2x256xf32, #tpu.memory_space<vmem>>, vector<2x32xf32>
    tpu.vector_store %arg4[%c0_12, %c32], %52 {strides = array<i32>} : memref<2x256xf32, #tpu.memory_space<vmem>>, vector<2x32xf32>,
    %cst_13 = arith.constant 0.000000e+00 : f32
    %54 = vector.broadcast %cst_13 : f32 to vector<2x60xf32>
    %55 = vector.extract_strided_slice %0 {offsets = [0, 1], sizes = [2, 1], strides = [1, 1]} : vector<2x8xi32> to vector<2x1xi32>
    %c0_i32_14 = arith.constant 0 : i32
    %56 = vector.broadcast %c0_i32_14 : i32 to vector<2x1xi32>
    %57 = arith.addi %55, %56 : vector<2x1xi32>
    %58 = vector.broadcast %57 : vector<2x1xi32> to vector<2x60xi32>
    %59 = arith.cmpi eq, %3, %58 : vector<2x60xi32>
    %60 = arith.extui %59 : vector<2x60xi1> to vector<2x60xi32>
    %61 = arith.sitofp %60 : vector<2x60xi32> to vector<2x60xf32>
    %62 = arith.addf %54, %61 : vector<2x60xf32>
    %63 = vector.extract_strided_slice %0 {offsets = [0, 2], sizes = [2, 1], strides = [1, 1]} : vector<2x8xi32> to vector<2x1xi32>
    %c20_i32_15 = arith.constant 20 : i32
    %64 = vector.broadcast %c20_i32_15 : i32 to vector<2x1xi32>
    %65 = arith.addi %63, %64 : vector<2x1xi32>
    %66 = vector.broadcast %65 : vector<2x1xi32> to vector<2x60xi32>
    %67 = arith.cmpi eq, %3, %66 : vector<2x60xi32>
    %68 = arith.extui %67 : vector<2x60xi1> to vector<2x60xi32>
    %69 = arith.sitofp %68 : vector<2x60xi32> to vector<2x60xf32>
    %70 = arith.addf %62, %69 : vector<2x60xf32>
    %71 = vector.extract_strided_slice %0 {offsets = [0, 3], sizes = [2, 1], strides = [1, 1]} : vector<2x8xi32> to vector<2x1xi32>
    %c40_i32_16 = arith.constant 40 : i32
    %72 = vector.broadcast %c40_i32_16 : i32 to vector<2x1xi32>
    %73 = arith.addi %71, %72 : vector<2x1xi32>
    %74 = vector.broadcast %73 : vector<2x1xi32> to vector<2x60xi32>
    %75 = arith.cmpi eq, %3, %74 : vector<2x60xi32>
    %76 = arith.extui %75 : vector<2x60xi1> to vector<2x60xi32>
    %77 = arith.sitofp %76 : vector<2x60xi32> to vector<2x60xf32>
    %78 = arith.addf %70, %77 : vector<2x60xf32>
    %cst_17 = arith.constant dense<0.000000e+00> : vector<2x32xf32>
    %79 = tpu.matmul %78, %1, %cst_17 {dimension_numbers = #tpu.dot_dimension_numbers<[1], [0], [0], [1], [0, 0, 1, 1], [], []>} : vector<2x60xf32>, vector<60x32xf32>, vector<2x32xf32> -> vector<2x32xf32>
    %80 = vector.broadcast %2 : vector<1x32xf32> to vector<2x32xf32>
    %81 = arith.addf %79, %80 : vector<2x32xf32>
    %c0_18 = arith.constant 0 : index
    %c64 = arith.constant 64 : index
    %82 = vector.load %arg4[%c0_18, %c64] : memref<2x256xf32, #tpu.memory_space<vmem>>, vector<2x32xf32>
    tpu.vector_store %arg4[%c0_18, %c64], %81 {strides = array<i32>} : memref<2x256xf32, #tpu.memory_space<vmem>>, vector<2x32xf32>,
    %cst_19 = arith.constant 0.000000e+00 : f32
    %83 = vector.broadcast %cst_19 : f32 to vector<2x60xf32>
    %84 = vector.extract_strided_slice %0 {offsets = [0, 2], sizes = [2, 1], strides = [1, 1]} : vector<2x8xi32> to vector<2x1xi32>
    %c0_i32_20 = arith.constant 0 : i32
    %85 = vector.broadcast %c0_i32_20 : i32 to vector<2x1xi32>
    %86 = arith.addi %84, %85 : vector<2x1xi32>
    %87 = vector.broadcast %86 : vector<2x1xi32> to vector<2x60xi32>
    %88 = arith.cmpi eq, %3, %87 : vector<2x60xi32>
    %89 = arith.extui %88 : vector<2x60xi1> to vector<2x60xi32>
    %90 = arith.sitofp %89 : vector<2x60xi32> to vector<2x60xf32>
    %91 = arith.addf %83, %90 : vector<2x60xf32>
    %92 = vector.extract_strided_slice %0 {offsets = [0, 3], sizes = [2, 1], strides = [1, 1]} : vector<2x8xi32> to vector<2x1xi32>
    %c20_i32_21 = arith.constant 20 : i32
    %93 = vector.broadcast %c20_i32_21 : i32 to vector<2x1xi32>
    %94 = arith.addi %92, %93 : vector<2x1xi32>
    %95 = vector.broadcast %94 : vector<2x1xi32> to vector<2x60xi32>
    %96 = arith.cmpi eq, %3, %95 : vector<2x60xi32>
    %97 = arith.extui %96 : vector<2x60xi1> to vector<2x60xi32>
    %98 = arith.sitofp %97 : vector<2x60xi32> to vector<2x60xf32>
    %99 = arith.addf %91, %98 : vector<2x60xf32>
    %100 = vector.extract_strided_slice %0 {offsets = [0, 4], sizes = [2, 1], strides = [1, 1]} : vector<2x8xi32> to vector<2x1xi32>
    %c40_i32_22 = arith.constant 40 : i32
    %101 = vector.broadcast %c40_i32_22 : i32 to vector<2x1xi32>
    %102 = arith.addi %100, %101 : vector<2x1xi32>
    %103 = vector.broadcast %102 : vector<2x1xi32> to vector<2x60xi32>
    %104 = arith.cmpi eq, %3, %103 : vector<2x60xi32>
    %105 = arith.extui %104 : vector<2x60xi1> to vector<2x60xi32>
    %106 = arith.sitofp %105 : vector<2x60xi32> to vector<2x60xf32>
    %107 = arith.addf %99, %106 : vector<2x60xf32>
    %cst_23 = arith.constant dense<0.000000e+00> : vector<2x32xf32>
    %108 = tpu.matmul %107, %1, %cst_23 {dimension_numbers = #tpu.dot_dimension_numbers<[1], [0], [0], [1], [0, 0, 1, 1], [], []>} : vector<2x60xf32>, vector<60x32xf32>, vector<2x32xf32> -> vector<2x32xf32>
    %109 = vector.broadcast %2 : vector<1x32xf32> to vector<2x32xf32>
    %110 = arith.addf %108, %109 : vector<2x32xf32>
    %c0_24 = arith.constant 0 : index
    %c96 = arith.constant 96 : index
    %111 = vector.load %arg4[%c0_24, %c96] : memref<2x256xf32, #tpu.memory_space<vmem>>, vector<2x32xf32>
    tpu.vector_store %arg4[%c0_24, %c96], %110 {strides = array<i32>} : memref<2x256xf32, #tpu.memory_space<vmem>>, vector<2x32xf32>,
    %cst_25 = arith.constant 0.000000e+00 : f32
    %112 = vector.broadcast %cst_25 : f32 to vector<2x60xf32>
    %113 = vector.extract_strided_slice %0 {offsets = [0, 3], sizes = [2, 1], strides = [1, 1]} : vector<2x8xi32> to vector<2x1xi32>
    %c0_i32_26 = arith.constant 0 : i32
    %114 = vector.broadcast %c0_i32_26 : i32 to vector<2x1xi32>
    %115 = arith.addi %113, %114 : vector<2x1xi32>
    %116 = vector.broadcast %115 : vector<2x1xi32> to vector<2x60xi32>
    %117 = arith.cmpi eq, %3, %116 : vector<2x60xi32>
    %118 = arith.extui %117 : vector<2x60xi1> to vector<2x60xi32>
    %119 = arith.sitofp %118 : vector<2x60xi32> to vector<2x60xf32>
    %120 = arith.addf %112, %119 : vector<2x60xf32>
    %121 = vector.extract_strided_slice %0 {offsets = [0, 4], sizes = [2, 1], strides = [1, 1]} : vector<2x8xi32> to vector<2x1xi32>
    %c20_i32_27 = arith.constant 20 : i32
    %122 = vector.broadcast %c20_i32_27 : i32 to vector<2x1xi32>
    %123 = arith.addi %121, %122 : vector<2x1xi32>
    %124 = vector.broadcast %123 : vector<2x1xi32> to vector<2x60xi32>
    %125 = arith.cmpi eq, %3, %124 : vector<2x60xi32>
    %126 = arith.extui %125 : vector<2x60xi1> to vector<2x60xi32>
    %127 = arith.sitofp %126 : vector<2x60xi32> to vector<2x60xf32>
    %128 = arith.addf %120, %127 : vector<2x60xf32>
    %129 = vector.extract_strided_slice %0 {offsets = [0, 5], sizes = [2, 1], strides = [1, 1]} : vector<2x8xi32> to vector<2x1xi32>
    %c40_i32_28 = arith.constant 40 : i32
    %130 = vector.broadcast %c40_i32_28 : i32 to vector<2x1xi32>
    %131 = arith.addi %129, %130 : vector<2x1xi32>
    %132 = vector.broadcast %131 : vector<2x1xi32> to vector<2x60xi32>
    %133 = arith.cmpi eq, %3, %132 : vector<2x60xi32>
    %134 = arith.extui %133 : vector<2x60xi1> to vector<2x60xi32>
    %135 = arith.sitofp %134 : vector<2x60xi32> to vector<2x60xf32>
    %136 = arith.addf %128, %135 : vector<2x60xf32>
    %cst_29 = arith.constant dense<0.000000e+00> : vector<2x32xf32>
    %137 = tpu.matmul %136, %1, %cst_29 {dimension_numbers = #tpu.dot_dimension_numbers<[1], [0], [0], [1], [0, 0, 1, 1], [], []>} : vector<2x60xf32>, vector<60x32xf32>, vector<2x32xf32> -> vector<2x32xf32>
    %138 = vector.broadcast %2 : vector<1x32xf32> to vector<2x32xf32>
    %139 = arith.addf %137, %138 : vector<2x32xf32>
    %c0_30 = arith.constant 0 : index
    %c128 = arith.constant 128 : index
    %140 = vector.load %arg4[%c0_30, %c128] : memref<2x256xf32, #tpu.memory_space<vmem>>, vector<2x32xf32>
    tpu.vector_store %arg4[%c0_30, %c128], %139 {strides = array<i32>} : memref<2x256xf32, #tpu.memory_space<vmem>>, vector<2x32xf32>,
    %cst_31 = arith.constant 0.000000e+00 : f32
    %141 = vector.broadcast %cst_31 : f32 to vector<2x60xf32>
    %142 = vector.extract_strided_slice %0 {offsets = [0, 4], sizes = [2, 1], strides = [1, 1]} : vector<2x8xi32> to vector<2x1xi32>
    %c0_i32_32 = arith.constant 0 : i32
    %143 = vector.broadcast %c0_i32_32 : i32 to vector<2x1xi32>
    %144 = arith.addi %142, %143 : vector<2x1xi32>
    %145 = vector.broadcast %144 : vector<2x1xi32> to vector<2x60xi32>
    %146 = arith.cmpi eq, %3, %145 : vector<2x60xi32>
    %147 = arith.extui %146 : vector<2x60xi1> to vector<2x60xi32>
    %148 = arith.sitofp %147 : vector<2x60xi32> to vector<2x60xf32>
    %149 = arith.addf %141, %148 : vector<2x60xf32>
    %150 = vector.extract_strided_slice %0 {offsets = [0, 5], sizes = [2, 1], strides = [1, 1]} : vector<2x8xi32> to vector<2x1xi32>
    %c20_i32_33 = arith.constant 20 : i32
    %151 = vector.broadcast %c20_i32_33 : i32 to vector<2x1xi32>
    %152 = arith.addi %150, %151 : vector<2x1xi32>
    %153 = vector.broadcast %152 : vector<2x1xi32> to vector<2x60xi32>
    %154 = arith.cmpi eq, %3, %153 : vector<2x60xi32>
    %155 = arith.extui %154 : vector<2x60xi1> to vector<2x60xi32>
    %156 = arith.sitofp %155 : vector<2x60xi32> to vector<2x60xf32>
    %157 = arith.addf %149, %156 : vector<2x60xf32>
    %158 = vector.extract_strided_slice %0 {offsets = [0, 6], sizes = [2, 1], strides = [1, 1]} : vector<2x8xi32> to vector<2x1xi32>
    %c40_i32_34 = arith.constant 40 : i32
    %159 = vector.broadcast %c40_i32_34 : i32 to vector<2x1xi32>
    %160 = arith.addi %158, %159 : vector<2x1xi32>
    %161 = vector.broadcast %160 : vector<2x1xi32> to vector<2x60xi32>
    %162 = arith.cmpi eq, %3, %161 : vector<2x60xi32>
    %163 = arith.extui %162 : vector<2x60xi1> to vector<2x60xi32>
    %164 = arith.sitofp %163 : vector<2x60xi32> to vector<2x60xf32>
    %165 = arith.addf %157, %164 : vector<2x60xf32>
    %cst_35 = arith.constant dense<0.000000e+00> : vector<2x32xf32>
    %166 = tpu.matmul %165, %1, %cst_35 {dimension_numbers = #tpu.dot_dimension_numbers<[1], [0], [0], [1], [0, 0, 1, 1], [], []>} : vector<2x60xf32>, vector<60x32xf32>, vector<2x32xf32> -> vector<2x32xf32>
    %167 = vector.broadcast %2 : vector<1x32xf32> to vector<2x32xf32>
    %168 = arith.addf %166, %167 : vector<2x32xf32>
    %c0_36 = arith.constant 0 : index
    %c160 = arith.constant 160 : index
    %169 = vector.load %arg4[%c0_36, %c160] : memref<2x256xf32, #tpu.memory_space<vmem>>, vector<2x32xf32>
    tpu.vector_store %arg4[%c0_36, %c160], %168 {strides = array<i32>} : memref<2x256xf32, #tpu.memory_space<vmem>>, vector<2x32xf32>,
    %cst_37 = arith.constant 0.000000e+00 : f32
    %170 = vector.broadcast %cst_37 : f32 to vector<2x60xf32>
    %171 = vector.extract_strided_slice %0 {offsets = [0, 5], sizes = [2, 1], strides = [1, 1]} : vector<2x8xi32> to vector<2x1xi32>
    %c0_i32_38 = arith.constant 0 : i32
    %172 = vector.broadcast %c0_i32_38 : i32 to vector<2x1xi32>
    %173 = arith.addi %171, %172 : vector<2x1xi32>
    %174 = vector.broadcast %173 : vector<2x1xi32> to vector<2x60xi32>
    %175 = arith.cmpi eq, %3, %174 : vector<2x60xi32>
    %176 = arith.extui %175 : vector<2x60xi1> to vector<2x60xi32>
    %177 = arith.sitofp %176 : vector<2x60xi32> to vector<2x60xf32>
    %178 = arith.addf %170, %177 : vector<2x60xf32>
    %179 = vector.extract_strided_slice %0 {offsets = [0, 6], sizes = [2, 1], strides = [1, 1]} : vector<2x8xi32> to vector<2x1xi32>
    %c20_i32_39 = arith.constant 20 : i32
    %180 = vector.broadcast %c20_i32_39 : i32 to vector<2x1xi32>
    %181 = arith.addi %179, %180 : vector<2x1xi32>
    %182 = vector.broadcast %181 : vector<2x1xi32> to vector<2x60xi32>
    %183 = arith.cmpi eq, %3, %182 : vector<2x60xi32>
    %184 = arith.extui %183 : vector<2x60xi1> to vector<2x60xi32>
    %185 = arith.sitofp %184 : vector<2x60xi32> to vector<2x60xf32>
    %186 = arith.addf %178, %185 : vector<2x60xf32>
    %187 = vector.extract_strided_slice %0 {offsets = [0, 7], sizes = [2, 1], strides = [1, 1]} : vector<2x8xi32> to vector<2x1xi32>
    %c40_i32_40 = arith.constant 40 : i32
    %188 = vector.broadcast %c40_i32_40 : i32 to vector<2x1xi32>
    %189 = arith.addi %187, %188 : vector<2x1xi32>
    %190 = vector.broadcast %189 : vector<2x1xi32> to vector<2x60xi32>
    %191 = arith.cmpi eq, %3, %190 : vector<2x60xi32>
    %192 = arith.extui %191 : vector<2x60xi1> to vector<2x60xi32>
    %193 = arith.sitofp %192 : vector<2x60xi32> to vector<2x60xf32>
    %194 = arith.addf %186, %193 : vector<2x60xf32>
    %cst_41 = arith.constant dense<0.000000e+00> : vector<2x32xf32>
    %195 = tpu.matmul %194, %1, %cst_41 {dimension_numbers = #tpu.dot_dimension_numbers<[1], [0], [0], [1], [0, 0, 1, 1], [], []>} : vector<2x60xf32>, vector<60x32xf32>, vector<2x32xf32> -> vector<2x32xf32>
    %196 = vector.broadcast %2 : vector<1x32xf32> to vector<2x32xf32>
    %197 = arith.addf %195, %196 : vector<2x32xf32>
    %c0_42 = arith.constant 0 : index
    %c192 = arith.constant 192 : index
    %198 = vector.load %arg4[%c0_42, %c192] : memref<2x256xf32, #tpu.memory_space<vmem>>, vector<2x32xf32>
    tpu.vector_store %arg4[%c0_42, %c192], %197 {strides = array<i32>} : memref<2x256xf32, #tpu.memory_space<vmem>>, vector<2x32xf32>,
    %cst_43 = arith.constant 0.000000e+00 : f32
    %199 = vector.broadcast %cst_43 : f32 to vector<2x60xf32>
    %200 = vector.extract_strided_slice %0 {offsets = [0, 6], sizes = [2, 1], strides = [1, 1]} : vector<2x8xi32> to vector<2x1xi32>
    %c0_i32_44 = arith.constant 0 : i32
    %201 = vector.broadcast %c0_i32_44 : i32 to vector<2x1xi32>
    %202 = arith.addi %200, %201 : vector<2x1xi32>
    %203 = vector.broadcast %202 : vector<2x1xi32> to vector<2x60xi32>
    %204 = arith.cmpi eq, %3, %203 : vector<2x60xi32>
    %205 = arith.extui %204 : vector<2x60xi1> to vector<2x60xi32>
    %206 = arith.sitofp %205 : vector<2x60xi32> to vector<2x60xf32>
    %207 = arith.addf %199, %206 : vector<2x60xf32>
    %208 = vector.extract_strided_slice %0 {offsets = [0, 7], sizes = [2, 1], strides = [1, 1]} : vector<2x8xi32> to vector<2x1xi32>
    %c20_i32_45 = arith.constant 20 : i32
    %209 = vector.broadcast %c20_i32_45 : i32 to vector<2x1xi32>
    %210 = arith.addi %208, %209 : vector<2x1xi32>
    %211 = vector.broadcast %210 : vector<2x1xi32> to vector<2x60xi32>
    %212 = arith.cmpi eq, %3, %211 : vector<2x60xi32>
    %213 = arith.extui %212 : vector<2x60xi1> to vector<2x60xi32>
    %214 = arith.sitofp %213 : vector<2x60xi32> to vector<2x60xf32>
    %215 = arith.addf %207, %214 : vector<2x60xf32>
    %cst_46 = arith.constant dense<0.000000e+00> : vector<2x32xf32>
    %216 = tpu.matmul %215, %1, %cst_46 {dimension_numbers = #tpu.dot_dimension_numbers<[1], [0], [0], [1], [0, 0, 1, 1], [], []>} : vector<2x60xf32>, vector<60x32xf32>, vector<2x32xf32> -> vector<2x32xf32>
    %217 = vector.broadcast %2 : vector<1x32xf32> to vector<2x32xf32>
    %218 = arith.addf %216, %217 : vector<2x32xf32>
    %c0_47 = arith.constant 0 : index
    %c224 = arith.constant 224 : index
    %219 = vector.load %arg4[%c0_47, %c224] : memref<2x256xf32, #tpu.memory_space<vmem>>, vector<2x32xf32>
    tpu.vector_store %arg4[%c0_47, %c224], %218 {strides = array<i32>} : memref<2x256xf32, #tpu.memory_space<vmem>>, vector<2x32xf32>,
    return
  }
  func.func @transform_0(%arg0: i32) -> (i32, i32) {
    %c0_i32 = arith.constant 0 : i32
    %c0_i32_0 = arith.constant 0 : i32
    return %arg0, %c0_i32 : i32, i32
  }
  func.func @transform_1(%arg0: i32) -> (i32, i32) {
    %c0_i32 = arith.constant 0 : i32
    %c0_i32_0 = arith.constant 0 : i32
    %c0_i32_1 = arith.constant 0 : i32
    return %c0_i32, %c0_i32_0 : i32, i32
  }
  func.func @transform_2(%arg0: i32) -> (i32, i32) {
    %c0_i32 = arith.constant 0 : i32
    %c0_i32_0 = arith.constant 0 : i32
    %c0_i32_1 = arith.constant 0 : i32
    return %c0_i32, %c0_i32_0 : i32, i32
  }
  func.func @transform_3(%arg0: i32) -> (i32, i32) {
    %c0_i32 = arith.constant 0 : i32
    %c0_i32_0 = arith.constant 0 : i32
    return %arg0, %c0_i32 : i32, i32
  }
}

</mosaic_0001>

<bundles_post_ra>
// kernel: tpu_custom_call.1
= control target key start
LH: loop header
LB: loop body
LE: loop exit
PB: predicated region body
PF: predicated region fallthrough
CT: control target
= control target key end

     0   :  { %v1295_v1 = vmov 0   ;;  %v1296_v8 = vmov 0.0|0.0   ;;  %s1570_s0 = inlined_call_operand.vmem [shape: s32[2,8], index: 0, kind: input, shape index: {}]   ;;  %s1571_s1 = inlined_call_operand.vmem [shape: f32[60,32], index: 1, kind: input, shape index: {}]   ;;  %s1572_s2 = inlined_call_operand.vmem [shape: f32[1,32], index: 2, kind: input, shape index: {}]   ;;  %s1573_s3 = inlined_call_operand.hbm [shape: f32[2,256], index: 3, kind: output, shape index: {}]  }
   0x1   :  { %v1335_v0 = vld [vmem:[%s1570_s0] sm:$0x3]  ;;  %1254 = vset.pattern.permute.xlu0 %v1295_v1  ;;  %1256 = vset.pattern.permute.xlu1 %v1295_v1  ;;  %v17_v4 = vld [vmem:[%s1571_s1 + $0x8] sm:$0xff]  ;;  %v18_v6 = vld [vmem:[%s1571_s1 + $0x10] sm:$0xff] }
   0x2   :  { %v1338_v2 = vadd.s32 20, %v1335_v0  ;;  %v16_v3 = vld [vmem:[%s1571_s1] sm:$0xff]  ;;  %130 = vperm.xlu0 %1254, %v1335_v0   ;;  %v19_v7 = vld [vmem:[%s1571_s1 + $0x18] sm:$0xff]  ;;  %1133 = vmatprep.subr.bf16.mxu0 %v1296_v8 }
   0x3   :  { %v1347_v5 = vpack.c.bf16 %v17_v4, %v16_v3 }
   0x4   :  { %29 = vperm.xlu1 %1256, %v1338_v2  }
   0x5   :  { %8 = vsyncpa [#allocation3], 0  ;;  %v1358_v9 = vadd.s32 40, %v1335_v0  ;;  %1135 = vmatpush3.bf16.msra.mxu0 %v1347_v5  ;;  %1146 = vmatprep.subr.bf16.mxu1 %v1296_v8  ;;  %v1362_v10 = vpack.c.bf16 %v19_v7, %v18_v6  ;;  %v20_v11 = vld [vmem:[%s1571_s1 + $0x20] sm:$0xff]  ;;  %v21_v12 = vld [vmem:[%s1571_s1 + $0x28] sm:$0xff]  ;;  %v1297_v13 = vmov 1   ;;  %v25_v26 = vlaneseq }
   0x6   :  { %1136 = vmatprep.subr.bf16.mxu0 %v1296_v8  ;;  %1148 = vmatpush3.bf16.msra.mxu1 %v1347_v5  ;;  %v1376_v14 = vpack.c.bf16 %v21_v12, %v20_v11  ;;  %v22_v15 = vld [vmem:[%s1571_s1 + $0x30] sm:$0xff]  ;;  %v23_v16 = vld [vmem:[%s1571_s1 + $0x38] sm:$0xf]  ;;  %vm53_vm0 = vcmask 1043456   ;;  %vm1298_vm1 = vmmov 0   ;;  %v1299_v17 = vmov 0.0  }
   0x7   :  { %1255 = vset.pattern.permute.xlu0 %v1297_v13  ;;  %1149 = vmatprep.subr.bf16.mxu1 %v1296_v8  ;;  %v1300_v18 = vmov 2   ;;  %v1391_v19 = vpack.c.bf16 %v23_v16, %v22_v15  ;;  %vm1301_vm2 = vmmov 1   ;;  %v1302_v21 = vmov 4   ;;  %s1308_s30 = smov 32   ;;  %s1310_s4 = smov 96  }
   0x8   :  { %1257 = vset.pattern.permute.xlu1 %v1297_v13  ;;  %137 = vperm.xlu0 %1255, %v1338_v2   ;;  %vm1395_vm3 = vmpackc.low %vm53_vm0, %vm1301_vm2  ;;  %v1303_v22 = vmov 3   ;;  %v1304_v23 = vmov 5   ;;  %v1305_v24 = vmov 6   ;;  %v1306_v25 = vmov 7   ;;  %s1311_s5 = smov [#allocation2]  }
   0x9   :  { %37 = vperm.xlu1 %1257, %v1358_v9   ;;  %1138 = vmatpush3.bf16.msra.mxu0 %v1362_v10  ;;  %v1428_v28 = vand.u32 127, %v25_v26  ;;  %vm49_vm8 = vcmask 490496   ;;  %s862_s6 = sshll.u32 %s1311_s5, 4  ;;  %s863_s6 = int_to_ptr.vmem [resolvable:$true] %s862_s6 }
   0xa   :  { %1139 = vmatprep.subr.bf16.mxu0 %v1296_v8  ;;  %1151 = vmatpush3.bf16.msra.mxu1 %v1362_v10  ;;  %s1271_s7 = scalar_lea.vmem %s863_s6, 64  ;;  %p1276_p1 = scmp.lt.s32.totalorder %s863_s6, %s863_s6 }
   0xb   :  { %1152 = vmatprep.subr.bf16.mxu1 %v1296_v8  ;;  %997 = vmatprep.mubr.msk.f32.mxu0 %vm1298_vm1, %v1299_v17  ;;  %p1272_p0 = scmp.ne.s32.totalorder %s863_s6, %s1271_s7  ;;  %p1277_p2 = scmp.lt.s32.totalorder %s1271_s7, %s1271_s7 }
   0xc   :  { %237 = vperm.xlu0 %1255, %v1335_v0   ;;  %1016 = vmatprep.mubr.msk.f32.mxu1 %vm1298_vm1, %v1299_v17 }
   0xd   :  { %1258 = vset.pattern.permute.xlu1 %v1300_v18  ;;  %1141 = vmatpush3.bf16.msra.mxu0 %v1376_v14  ;;  %p1278_p3 = por %p1277_p2, %p1276_p1 }
   0xe   :  { %144 = vperm.xlu1 %1258, %v1358_v9   ;;  %1142 = vmatprep.subr.bf16.mxu0 %v1296_v8 }
   0xf   :  { %1154 = vmatpush3.bf16.msra.mxu1 %v1376_v14  ;;  %p1279_p4 = pnand %p1278_p3, %p1272_p0 }
  0x10   :  { %1259 = vset.pattern.permute.xlu0 %v1300_v18  ;;  %1155 = vmatprep.subr.bf16.mxu1 %v1296_v8 }
  0x11   :  { %344 = vperm.xlu0 %1259, %v1335_v0   ;;  %1145 = vmatpush3.bf16.msk.msra.mxu0 %vm1395_vm3, %v1391_v19 }
  0x12   :  { %244 = vperm.xlu1 %1258, %v1338_v2   ;;  %1159 = vmatprep.subr.bf16.mxu0 %v1296_v8 }
  0x13   :  { %1158 = vmatpush3.bf16.msk.msra.mxu1 %vm1395_vm3, %v1391_v19 }
  0x14   :  { %1172 = vmatprep.subr.bf16.mxu1 %v1296_v8 }
  0x15   :  { %1261 = vset.pattern.permute.xlu0 %v1302_v21 }
  0x16   :  { %1260 = vset.pattern.permute.xlu1 %v1303_v22  ;;  %358 = vperm.xlu0 %1261, %v1358_v9  }
  0x17   :  { %351 = vperm.xlu1 %1260, %v1338_v2  }
  0x1a   :  { %546 = vperm.xlu0 %1261, %v1335_v0  }
  0x1b   :  { %251 = vperm.xlu1 %1260, %v1358_v9  }
  0x1e   :  { %1264 = vset.pattern.permute.xlu0 %v1304_v23 }
  0x1f   :  { %451 = vperm.xlu1 %1260, %v1335_v0   ;;  %465 = vperm.xlu0 %1264, %v1358_v9  }
  0x23   :  { %1262 = vset.pattern.permute.xlu1 %v1302_v21  ;;  %1267 = vset.pattern.permute.xlu0 %v1305_v24 }
  0x24   :  { %458 = vperm.xlu1 %1262, %v1338_v2   ;;  %659 = vperm.xlu0 %1267, %v1338_v2  }
  0x28   :  { %1263 = vset.pattern.permute.xlu1 %v1304_v23  ;;  %1270 = vset.pattern.permute.xlu0 %v1306_v25 }
  0x29   :  { %553 = vperm.xlu1 %1263, %v1338_v2   ;;  %765 = vperm.xlu0 %1270, %v1338_v2  }
  0x2d   :  { %1265 = vset.pattern.permute.xlu1 %v1305_v24 }
  0x2e   :  { %560 = vperm.xlu1 %1265, %v1358_v9  }
  0x32   :  { %1266 = vset.pattern.permute.xlu1 %v1304_v23 }
  0x33   :  { %652 = vperm.xlu1 %1266, %v1335_v0  }
  0x37   :  { %1268 = vset.pattern.permute.xlu1 %v1306_v25 }
  0x38   :  { %666 = vperm.xlu1 %1268, %v1358_v9  }
  0x3c   :  { %1269 = vset.pattern.permute.xlu1 %v1305_v24 }
  0x3d   :  { %758 = vperm.xlu1 %1269, %v1335_v0  }
  0x81   :  { %v131_v27 = vpop.permute.xlu0 %130 }
  0x82   :  { %vm132_vm5 = vcmp.eq.s32.totalorder %v1428_v28, %v131_v27 }
  0x83   :  { %v30_v29 = vpop.permute.xlu1 %29  ;;  %v875_v34 = vsel %vm132_vm5, 1.0, %v1299_v17 }
  0x84   :  { %vm31_vm4 = vcmp.eq.s32.totalorder %v1428_v28, %v30_v29 }
  0x85   :  { %v870_v32 = vsel %vm31_vm4, 1.0, %v1299_v17 }
  0x87   :  { %v138_v30 = vpop.permute.xlu0 %137 }
  0x88   :  { %vm139_vm6 = vcmp.eq.s32.totalorder %v1428_v28, %v138_v30  ;;  %v38_v31 = vpop.permute.xlu1 %37 }
  0x89   :  { %vm39_vm7 = vcmp.eq.s32.totalorder %v1428_v28, %v38_v31  ;;  %v876_v35 = vsel %vm139_vm6, 1.0, %v1299_v17 }
  0x8a   :  { %v871_v33 = vsel %vm39_vm7, 1.0, %v1299_v17  ;;  %v142_v39 = vadd.f32 %v876_v35, %v875_v34 }
  0x8b   :  { %v42_v36 = vadd.f32 %v871_v33, %v870_v32  ;;  %v238_v37 = vpop.permute.xlu0 %237 }
  0x8c   :  { %vm239_vm12 = vcmp.eq.s32.totalorder %v1428_v28, %v238_v37 }
  0x8d   :  { %998 = vmatmul.mubr.msk.f32.vlgmr.msra.gmra.mrb[0].mxu0 %vm49_vm8, %v42_v36  ;;  %v145_v38 = vpop.permute.xlu1 %144  ;;  %v880_v49 = vsel %vm239_vm12, 1.0, %v1299_v17 }
  0x8e   :  { %vm146_vm9 = vcmp.eq.s32.totalorder %v1428_v28, %v145_v38  ;;  %1161 = vmatpush3.bf16.msra.mxu0 %v1347_v5  ;;  %1035 = vmatprep.mubr.msk.f32.mxu0 %vm1298_vm1, %v1299_v17 }
  0x8f   :  { %v877_v40 = vsel %vm146_vm9, 1.0, %v1299_v17  ;;  %1162 = vmatprep.subr.bf16.mxu0 %v1296_v8 }
  0x90   :  { %v149_v41 = vadd.f32 %v877_v40, %v142_v39  ;;  %v345_v43 = vpop.permute.xlu0 %344 }
  0x91   :  { %v245_v42 = vpop.permute.xlu1 %244  ;;  %vm346_vm11 = vcmp.eq.s32.totalorder %v1428_v28, %v345_v43 }
  0x92   :  { %1017 = vmatmul.mubr.msk.f32.vlgmr.msra.gmra.mrb[0].mxu1 %vm49_vm8, %v149_v41  ;;  %1164 = vmatpush3.bf16.msra.mxu0 %v1362_v10  ;;  %vm246_vm10 = vcmp.eq.s32.totalorder %v1428_v28, %v245_v42  ;;  %v885_v47 = vsel %vm346_vm11, 1.0, %v1299_v17 }
  0x93   :  { %1174 = vmatpush3.bf16.msra.mxu1 %v1347_v5  ;;  %1165 = vmatprep.subr.bf16.mxu0 %v1296_v8  ;;  %v881_v46 = vsel %vm246_vm10, 1.0, %v1299_v17 }
  0x94   :  { %1175 = vmatprep.subr.bf16.mxu1 %v1296_v8  ;;  %1054 = vmatprep.mubr.msk.f32.mxu1 %vm1298_vm1, %v1299_v17  ;;  %v249_v51 = vadd.f32 %v881_v46, %v880_v49 }
  0x95   :  { %v359_v45 = vpop.permute.xlu0 %358 }
  0x96   :  { %v352_v44 = vpop.permute.xlu1 %351  ;;  %1167 = vmatpush3.bf16.msra.mxu0 %v1376_v14  ;;  %vm360_vm14 = vcmp.eq.s32.totalorder %v1428_v28, %v359_v45 }
  0x97   :  { %vm353_vm13 = vcmp.eq.s32.totalorder %v1428_v28, %v352_v44  ;;  %1177 = vmatpush3.bf16.msra.mxu1 %v1362_v10  ;;  %1168 = vmatprep.subr.bf16.mxu0 %v1296_v8  ;;  %v887_v54 = vsel %vm360_vm14, 1.0, %v1299_v17  ;;  %vm448_vm14 = vcmask 1042176  }
  0x98   :  { %1178 = vmatprep.subr.bf16.mxu1 %v1296_v8  ;;  %v886_v48 = vsel %vm353_vm13, 1.0, %v1299_v17  ;;  %vm127_vm13 = vcmask 254976  }
  0x99   :  { %v356_v52 = vadd.f32 %v886_v48, %v885_v47  ;;  %v547_v58 = vpop.permute.xlu0 %546 }
  0x9a   :  { %v252_v50 = vpop.permute.xlu1 %251  ;;  %1171 = vmatpush3.bf16.msk.msra.mxu0 %vm1395_vm3, %v1391_v19  ;;  %vm548_vm6 = vcmp.eq.s32.totalorder %v1428_v28, %v547_v58 }
  0x9b   :  { %vm253_vm15 = vcmp.eq.s32.totalorder %v1428_v28, %v252_v50  ;;  %1180 = vmatpush3.bf16.msra.mxu1 %v1376_v14  ;;  %1185 = vmatprep.subr.bf16.mxu0 %v1296_v8  ;;  %v363_v57 = vadd.f32 %v887_v54, %v356_v52  ;;  %v895_v3 = vsel %vm548_vm6, 1.0, %v1299_v17 }
  0x9c   :  { %v882_v53 = vsel %vm253_vm15, 1.0, %v1299_v17  ;;  %1181 = vmatprep.subr.bf16.mxu1 %v1296_v8 }
  0x9d   :  { %v256_v55 = vadd.f32 %v882_v53, %v249_v51 }
  0x9e   :  { %v452_v56 = vpop.permute.xlu1 %451  ;;  %v466_v60 = vpop.permute.xlu0 %465 }
  0x9f   :  { %1184 = vmatpush3.bf16.msk.msra.mxu1 %vm1395_vm3, %v1391_v19  ;;  %1036 = vmatmul.mubr.msk.f32.vlgmr.msra.gmra.mrb[2].mxu0 %vm49_vm8, %v256_v55  ;;  %vm453_vm2 = vcmp.eq.s32.totalorder %v1428_v28, %v452_v56  ;;  %vm467_vm4 = vcmp.eq.s32.totalorder %v1428_v28, %v466_v60 }
  0xa0   :  { %1187 = vmatpush3.bf16.msra.mxu0 %v1347_v5  ;;  %1198 = vmatprep.subr.bf16.mxu1 %v1296_v8  ;;  %v890_v62 = vsel %vm453_vm2, 1.0, %v1299_v17  ;;  %v892_v1 = vsel %vm467_vm4, 1.0, %v1299_v17 }
  0xa1   :  { %1188 = vmatprep.subr.bf16.mxu0 %v1296_v8  ;;  %1073 = vmatprep.mubr.msk.f32.mxu0 %vm1298_vm1, %v1299_v17 }
  0xa2   :  { %1055 = vmatmul.mubr.msk.f32.vlgmr.msra.gmra.mrb[2].mxu1 %vm49_vm8, %v363_v57 }
  0xa3   :  { %1200 = vmatpush3.bf16.msra.mxu1 %v1347_v5  ;;  %v459_v59 = vpop.permute.xlu1 %458  ;;  %1092 = vmatprep.mubr.msk.f32.mxu1 %vm1298_vm1, %v1299_v17  ;;  %v660_v13 = vpop.permute.xlu0 %659 }
  0xa4   :  { %vm460_vm0 = vcmp.eq.s32.totalorder %v1428_v28, %v459_v59  ;;  %1190 = vmatpush3.bf16.msra.mxu0 %v1362_v10  ;;  %1201 = vmatprep.subr.bf16.mxu1 %v1296_v8  ;;  %vm661_vm10 = vcmp.eq.s32.totalorder %v1428_v28, %v660_v13 }
  0xa5   :  { %1191 = vmatprep.subr.bf16.mxu0 %v1296_v8  ;;  %v891_v61 = vsel %vm460_vm0, 1.0, %v1299_v17 }
  0xa6   :  { %v463_v0 = vadd.f32 %v891_v61, %v890_v62 }
  0xa7   :  { %1203 = vmatpush3.bf16.msra.mxu1 %v1362_v10 }
  0xa8   :  { %1193 = vmatpush3.bf16.msra.mxu0 %v1376_v14  ;;  %v554_v63 = vpop.permute.xlu1 %553  ;;  %1204 = vmatprep.subr.bf16.mxu1 %v1296_v8  ;;  %v470_v4 = vadd.f32 %v892_v1, %v463_v0  ;;  %v766_v15 = vpop.permute.xlu0 %765 }
  0xa9   :  { %vm555_vm5 = vcmp.eq.s32.totalorder %v1428_v28, %v554_v63  ;;  %1194 = vmatprep.subr.bf16.mxu0 %v1296_v8  ;;  %vm767_vm11 = vcmp.eq.s32.totalorder %v1428_v28, %v766_v15 }
  0xaa   :  { %v896_v2 = vsel %vm555_vm5, 1.0, %v1299_v17  ;;  %v906_v23 = vsel %vm767_vm11, 1.0, %v1299_v17 }
  0xab   :  { %1206 = vmatpush3.bf16.msra.mxu1 %v1376_v14  ;;  %v558_v7 = vadd.f32 %v896_v2, %v895_v3 }
  0xac   :  { %1197 = vmatpush3.bf16.msk.msra.mxu0 %vm1395_vm3, %v1391_v19  ;;  %1207 = vmatprep.subr.bf16.mxu1 %v1296_v8 }
  0xad   :  { %v561_v6 = vpop.permute.xlu1 %560  ;;  %1211 = vmatprep.subr.bf16.mxu0 %v1296_v8 }
  0xae   :  { %vm562_vm7 = vcmp.eq.s32.totalorder %v1428_v28, %v561_v6 }
  0xaf   :  { %v897_v9 = vsel %vm562_vm7, 1.0, %v1299_v17  ;;  %1074 = vmatmul.mubr.msk.f32.vlgmr.msra.gmra.mrb[4].mxu0 %vm49_vm8, %v470_v4  ;;  %1210 = vmatpush3.bf16.msk.msra.mxu1 %vm1395_vm3, %v1391_v19 }
  0xb0   :  { %v565_v11 = vadd.f32 %v897_v9, %v558_v7  ;;  %1213 = vmatpush3.bf16.msra.mxu0 %v1347_v5  ;;  %1224 = vmatprep.subr.bf16.mxu1 %v1296_v8 }
  0xb1   :  { %1214 = vmatprep.subr.bf16.mxu0 %v1296_v8  ;;  %1111 = vmatprep.mubr.msk.f32.mxu0 %vm1298_vm1, %v1299_v17 }
  0xb2   :  { %1093 = vmatmul.mubr.msk.f32.vlgmr.msra.gmra.mrb[4].mxu1 %vm49_vm8, %v565_v11  ;;  %v653_v12 = vpop.permute.xlu1 %652 }
  0xb3   :  { %1226 = vmatpush3.bf16.msra.mxu1 %v1347_v5  ;;  %1130 = vmatprep.mubr.msk.f32.mxu1 %vm1298_vm1, %v1299_v17  ;;  %vm654_vm9 = vcmp.eq.s32.totalorder %v1428_v28, %v653_v12  ;;  %v901_v5 = vsel %vm661_vm10, 1.0, %v1299_v17 }
  0xb4   :  { %1216 = vmatpush3.bf16.msra.mxu0 %v1362_v10  ;;  %1227 = vmatprep.subr.bf16.mxu1 %v1296_v8  ;;  %v900_v18 = vsel %vm654_vm9, 1.0, %v1299_v17 }
  0xb5   :  { %1217 = vmatprep.subr.bf16.mxu0 %v1296_v8  ;;  %v664_v22 = vadd.f32 %v901_v5, %v900_v18 }
  0xb7   :  { %1229 = vmatpush3.bf16.msra.mxu1 %v1362_v10  ;;  %v667_v16 = vpop.permute.xlu1 %666 }
  0xb8   :  { %vm668_vm1 = vcmp.eq.s32.totalorder %v1428_v28, %v667_v16  ;;  %1219 = vmatpush3.bf16.msra.mxu0 %v1376_v14  ;;  %1230 = vmatprep.subr.bf16.mxu1 %v1296_v8 }
  0xb9   :  { %1220 = vmatprep.subr.bf16.mxu0 %v1296_v8  ;;  %v902_v21 = vsel %vm668_vm1, 1.0, %v1299_v17 }
  0xba   :  { %v671_v24 = vadd.f32 %v902_v21, %v664_v22 }
  0xbb   :  { %1232 = vmatpush3.bf16.msra.mxu1 %v1376_v14  ;;  %v1307_v14 = vmov 1983009808  }
  0xbc   :  { %1223 = vmatpush3.bf16.msk.msra.mxu0 %vm1395_vm3, %v1391_v19  ;;  %v759_v10 = vpop.permute.xlu1 %758  ;;  %1233 = vmatprep.subr.bf16.mxu1 %v1296_v8  ;;  %v225_v29 = vunpack.c.l.s4 %v1307_v14  ;;  %v872_v8 = vld [vmem:[%s1572_s2] ss:$0 sm:$0xff]  ;;  %s1309_s2 = smov 64  }
  0xbd   :  { %vm760_vm12 = vcmp.eq.s32.totalorder %v1428_v28, %v759_v10 }
  0xbe   :  { %v905_v25 = vsel %vm760_vm12, 1.0, %v1299_v17  ;;  %v226_v28 = vunpack.c.0.s8 %v225_v29  ;;  %v228_v17 = vshrl.u32 %v25_v26, 7 }
  0xbf   :  { %v770_v27 = vadd.f32 %v906_v23, %v905_v25  ;;  %1112 = vmatmul.mubr.msk.f32.vlgmr.msra.gmra.mrb[6].mxu0 %vm49_vm8, %v671_v24  ;;  %1236 = vmatpush3.bf16.msk.msra.mxu1 %vm1395_vm3, %v1391_v19  ;;  %vm234_vm3 = vcmask 517376  }
  0xc0   :  { %v229_v33 = vsub.s32 %v226_v28, %v228_v17 }
  0xc2   :  { %1131 = vmatmul.mubr.msk.f32.vlgmr.msra.gmra.mrb[6].mxu1 %vm49_vm8, %v770_v27  ;;  %vm341_vm8 = vcmask 779776  }
 0x160   :  { %v123_v30 = vpop.f32.mrb[0].mxu0 }
 0x161   :  { %v124_v31 = vadd.f32 %v872_v8, %v123_v30  ;;  %v999_v32 = vpop.f32.mrb[1].mxu0 }
 0x163   :  { %128 = vst.msk [vmem:[#allocation2] sm:$0x3] %vm127_vm13, %v124_v31 }
 0x165   :  { %v219_v20 = vpop.f32.mrb[0].mxu1 }
 0x166   :  { %v220_v19 = vadd.f32 %v872_v8, %v219_v20  ;;  %v1018_v34 = vpop.f32.mrb[1].mxu1 }
 0x168   :  { %v230_v35 = vrot.slane %v220_v19, %v229_v33 }
 0x16a   :  { %231 = vrot.lane.b32.xlu1 %v230_v35, %s1308_s30 }
 0x172   :  { %v326_v36 = vpop.f32.mrb[2].mxu0 }
 0x173   :  { %v327_v37 = vadd.f32 %v872_v8, %v326_v36  ;;  %v1037_v38 = vpop.f32.mrb[3].mxu0 }
 0x175   :  { %v337_v39 = vrot.slane %v327_v37, %v229_v33  ;;  %v433_v40 = vpop.f32.mrb[2].mxu1 }
 0x176   :  { %v434_v41 = vadd.f32 %v872_v8, %v433_v40  ;;  %v1056_v42 = vpop.f32.mrb[3].mxu1 }
 0x177   :  { %338 = vrot.lane.b32.xlu0 %v337_v39, %s1309_s2 }
 0x178   :  { %v444_v26 = vrot.slane %v434_v41, %v229_v33 }
 0x17b   :  { %445 = vrot.lane.b32.xlu0 %v444_v26, %s1310_s4 }
 0x182   :  { %v540_v43 = vpop.f32.mrb[4].mxu0 }
 0x183   :  { %v541_v44 = vadd.f32 %v872_v8, %v540_v43  ;;  %v1075_v45 = vpop.f32.mrb[5].mxu0 }
 0x185   :  { %544 = vst.msk [vmem:[#allocation2 + $0x2] sm:$0x3] %vm127_vm13, %v541_v44  ;;  %v635_v46 = vpop.f32.mrb[4].mxu1 }
 0x186   :  { %v636_v47 = vadd.f32 %v872_v8, %v635_v46  ;;  %v1094_v48 = vpop.f32.mrb[5].mxu1 }
 0x188   :  { %v646_v49 = vrot.slane %v636_v47, %v229_v33 }
 0x18a   :  { %647 = vrot.lane.b32.xlu1 %v646_v49, %s1308_s30 }
 0x192   :  { %v741_v50 = vpop.f32.mrb[6].mxu0 }
 0x193   :  { %v742_v51 = vadd.f32 %v872_v8, %v741_v50  ;;  %v1113_v52 = vpop.f32.mrb[7].mxu0 }
 0x195   :  { %v752_v53 = vrot.slane %v742_v51, %v229_v33  ;;  %v840_v54 = vpop.f32.mrb[6].mxu1 }
 0x196   :  { %v841_v55 = vadd.f32 %v872_v8, %v840_v54  ;;  %v1132_v56 = vpop.f32.mrb[7].mxu1 }
 0x197   :  { %753 = vrot.lane.b32.xlu1 %v752_v53, %s1309_s2 }
 0x198   :  { %v851_v57 = vrot.slane %v841_v55, %v229_v33 }
 0x19b   :  { %852 = vrot.lane.b32.xlu1 %v851_v57, %s1310_s4 }
 0x1dc   :  { %v232_v58 = vpop.permute.xlu1 %231 }
 0x1dd   :  { %235 = vst.msk [vmem:[#allocation2] sm:$0x3] %vm234_vm3, %v232_v58 }
 0x1e9   :  { %v339_v59 = vpop.permute.xlu0 %338 }
 0x1ea   :  { %342 = vst.msk [vmem:[#allocation2] sm:$0x3] %vm341_vm8, %v339_v59 }
 0x1ed   :  { %v446_v60 = vpop.permute.xlu0 %445 }
 0x1ee   :  { %449 = vst.msk [vmem:[#allocation2] sm:$0x3] %vm448_vm14, %v446_v60 }
 0x1fc   :  { %v648_v61 = vpop.permute.xlu1 %647 }
 0x1fd   :  { %650 = vst.msk [vmem:[#allocation2 + $0x2] sm:$0x3] %vm234_vm3, %v648_v61 }
 0x209   :  { %v754_v62 = vpop.permute.xlu1 %753 }
 0x20a   :  { %756 = vst.msk [vmem:[#allocation2 + $0x2] sm:$0x3] %vm341_vm8, %v754_v62 }
 0x20d   :  { %v853_v63 = vpop.permute.xlu1 %852 }
 0x20e   :  { %855 = vst.msk [vmem:[#allocation2 + $0x2] sm:$0x3] %vm448_vm14, %v853_v63 }
 0x20f   :  { %1282 = shalt.err (!%p1279_p4)
}
 0x210   :  { %s1283_s10 = scalar_lea.hbm %s1573_s3, 64 }
 0x211   :  { %p1284_p5 = scmp.ne.s32.totalorder %s1573_s3, %s1283_s10  ;;  %p1287_p6 = scmp.lt.u32.totalorder %s1283_s10, %s1573_s3 }
 0x213   :  { %p1289_p7 = pnand %p1287_p6, %p1284_p5 }
 0x215   :  { %1292 = shalt.err (!%p1289_p7)
}
 0x216   :  { %865 = dma.vmem_to_hbm [thread:$0]  %s863_s6, 64, %s1573_s3, [#allocation3]  }
 0x217   :  { %1293 = dma.done.wait [#allocation3], 64  }
 0x218   :  { %1294 = vsyncadd [#allocation3], 4294967232 }
 0x219   :  { %869 = vsyncpa [#allocation3], 1 }

</bundles_post_ra>
